<compile_context>
chip_gen: v7x
topology: tpu7x:2x2x1
jax: 0.10.0
libtpu: 0.0.40
codegen_flags: <defaults>
</compile_context>

<pallas_src>
import functools

import jax
import jax.numpy as jnp
import numpy as np
from jax.experimental import pallas as pl
from jax.experimental.pallas import tpu as pltpu


def _round_up(x, m):
    return ((x + m - 1) // m) * m


# -----------------------------------------------------------------------------
# Fused kernel.
#   grid = (B, n_row_tiles, n_chunks); chunk axis is the reduction ("arbitrary").
#   nb_ref  : [TM, K]        int32   neighbor indices of this row tile (-1 = pad)
#   zr_ref  : [TM, v_feats]  bf16    Z rows of this row tile
#   zc_ref  : [TN, v_feats]  bf16    Z rows of the current neighbor chunk
#   wr_ref  : [v_feats, Fp]  bf16    Wr (zero-padded to lane-dense Fp)
#   wnr_ref : [v_feats, Fp]  f32     Wnr (zero-padded to lane-dense Fp)
#   o_ref   : [TM, Fp]       f32     output tile (written on last chunk only)
#   acc_ref : [TM, v_feats]  f32     running sum of neighbor Z rows
# -----------------------------------------------------------------------------
def _gnn_kernel(nb_ref, zr_ref, zc_ref, wr_ref, wnr_ref, o_ref, acc_ref):
    c = pl.program_id(2)
    nc = pl.num_programs(2)

    @pl.when(c == 0)
    def _():
        acc_ref[...] = jnp.zeros_like(acc_ref)

    nb = nb_ref[...]                                     # [TM, K] i32
    TM, K = nb.shape
    TN = zc_ref.shape[0]

    # Chunk-local one-hot counts: agg[i, j] = #{k : nb[i, k] == c*TN + j}.
    # -1 padding and indices in other chunks never match the [0, TN) iota.
    local = nb - c * TN                                  # [TM, K] i32
    col = jax.lax.broadcasted_iota(jnp.int32, (TM, TN), 1)
    agg = jnp.zeros((TM, TN), jnp.float32)
    for k in range(K):                                   # K is small & static -> unrolled
        agg = agg + (col == local[:, k:k + 1]).astype(jnp.float32)

    # counts <= K are exact in bf16 -> native-rate bf16 MXU dot, f32 accumulate.
    acc_ref[...] += jnp.dot(agg.astype(jnp.bfloat16), zc_ref[...],
                            preferred_element_type=jnp.float32)

    @pl.when(c == nc - 1)
    def _():
        valid = (nb > -1).astype(jnp.float32)            # [TM, K]
        norm = jnp.sum(valid, axis=1, keepdims=True)     # [TM, 1]
        inv = pl.reciprocal(jnp.where(norm == 0.0, 1.0, norm))   # exact (norm[norm==0]=1)
        zmean = acc_ref[...] * inv                       # [TM, v_feats] f32

        rs = jnp.dot(zr_ref[...], wr_ref[...],           # bf16 MXU, f32 acc
                     preferred_element_type=jnp.float32)
        neigh = jnp.dot(zmean, wnr_ref[...],             # tiny f32 dot (no re-rounding)
                        preferred_element_type=jnp.float32)
        o_ref[...] = jnp.maximum(rs + neigh, 0.0)        # relu


# -----------------------------------------------------------------------------
# Weight preparation (hoisted: done once per weight set, not per forward call).
# -----------------------------------------------------------------------------
def prepare_weights(Wr, Wnr):
    v_feats, F = Wr.shape
    F_pad = _round_up(F, 128)                            # lane-dense output width
    Wr_p = jnp.zeros((v_feats, F_pad), jnp.bfloat16).at[:, :F].set(
        Wr.astype(jnp.bfloat16))
    Wnr_p = jnp.zeros((v_feats, F_pad), jnp.float32).at[:, :F].set(
        Wnr.astype(jnp.float32))
    return Wr_p, Wnr_p, F


# -----------------------------------------------------------------------------
# Batched forward: both proteins in ONE pallas_call.
# -----------------------------------------------------------------------------
@functools.partial(jax.jit, static_argnames=("F",))
def _gnn_forward(Z0, nb0, Z1, nb1, Wr_p, Wnr_p, *, F):
    N0, v_feats = Z0.shape
    N1 = Z1.shape[0]
    K = nb0.shape[1]
    F_pad = Wr_p.shape[1]

    maxN = max(N0, N1)
    # Row tile: multiple of 16 (bf16 sublane packing), capped at 128.
    TM = min(128, _round_up(max(maxN, 16), 16))
    n_row_needed = (maxN + TM - 1) // TM
    # Neighbor-base chunk: multiple of TM, up to 4*TM (~512 at TM=128). VMEM per
    # grid step stays well under the default scoped limit for any protein size.
    TN = TM * min(4, n_row_needed)
    N_pad = _round_up(maxN, TN)
    n_tiles = N_pad // TM
    n_chunks = N_pad // TN

    def pad_Z(Z):
        return jnp.pad(Z.astype(jnp.bfloat16), ((0, N_pad - Z.shape[0]), (0, 0)))

    def pad_nb(nb):
        return jnp.pad(nb.astype(jnp.int32), ((0, N_pad - nb.shape[0]), (0, 0)),
                       constant_values=-1)

    Zb = jnp.stack([pad_Z(Z0), pad_Z(Z1)])               # [2, N_pad, v_feats] bf16
    nbb = jnp.stack([pad_nb(nb0), pad_nb(nb1)])          # [2, N_pad, K]       i32

    out = pl.pallas_call(
        _gnn_kernel,
        out_shape=jax.ShapeDtypeStruct((2, N_pad, F_pad), jnp.float32),
        grid=(2, n_tiles, n_chunks),
        in_specs=[
            pl.BlockSpec((None, TM, K), lambda b, i, c: (b, i, 0)),
            pl.BlockSpec((None, TM, v_feats), lambda b, i, c: (b, i, 0)),
            pl.BlockSpec((None, TN, v_feats), lambda b, i, c: (b, c, 0)),
            pl.BlockSpec((v_feats, F_pad), lambda b, i, c: (0, 0)),
            pl.BlockSpec((v_feats, F_pad), lambda b, i, c: (0, 0)),
        ],
        out_specs=pl.BlockSpec((None, TM, F_pad), lambda b, i, c: (b, i, 0)),
        scratch_shapes=[pltpu.VMEM((TM, v_feats), jnp.float32)],
        compiler_params=pltpu.CompilerParams(
            dimension_semantics=("parallel", "parallel", "arbitrary")),
    )(nbb, Zb, Zb, Wr_p, Wnr_p)

    return out[0, :N0, :F], out[1, :N1, :F]


def gnn_layer(x, params):
    """x = ((Z0, neighbors0), (Z1, neighbors1)); params = prepare_weights(Wr, Wnr)."""
    (Z0, nb0), (Z1, nb1) = x
    Wr_p, Wnr_p, F = params
    out0, out1 = _gnn_forward(Z0, nb0, Z1, nb1, Wr_p, Wnr_p, F=F)
    return ((out0, nb0), (out1, nb1))


# -----------------------------------------------------------------------------
# Pure-JAX reference mirroring the kernel's precision policy (bf16 inputs to the
# big MXU dots, f32 accumulation / elementwise, f32 final projection).
# -----------------------------------------------------------------------------
def _ref_protein(Z, nb, Wr, Wnr):
    Zb = Z.astype(jnp.bfloat16)
    rs = jnp.dot(Zb, Wr.astype(jnp.bfloat16), preferred_element_type=jnp.float32)
    valid = nb > -1
    mask = valid[:, :, None].astype(jnp.float32)
    gathered = Zb[nb].astype(jnp.float32) * mask          # invalid indices masked
    norm = jnp.sum(valid, axis=1, keepdims=True).astype(jnp.float32)
    norm = jnp.where(norm == 0.0, 1.0, norm)
    zmean = jnp.sum(gathered, axis=1) * (1.0 / norm)
    neigh = jnp.dot(zmean, Wnr.astype(jnp.float32),
                    precision=jax.lax.Precision.HIGHEST,
                    preferred_element_type=jnp.float32)
    return jax.nn.relu(rs + neigh)


if __name__ == "__main__":
    v_feats, filters, K = 32, 32, 10     # module defaults: neighbors=10
    N0, N1 = 64, 48                      # two proteins of different sizes

    key = jax.random.PRNGKey(0)
    kz0, kz1, kn0, kn1, kwr, kwnr = jax.random.split(key, 6)

    Z0 = jax.random.normal(kz0, (N0, v_feats), dtype=jnp.float32)
    Z1 = jax.random.normal(kz1, (N1, v_feats), dtype=jnp.float32)
    # neighbor indices in [-1, N), -1 means "no neighbor"
    nb0 = jax.random.randint(kn0, (N0, K), -1, N0, dtype=jnp.int32)
    nb1 = jax.random.randint(kn1, (N1, K), -1, N1, dtype=jnp.int32)

    # deterministic "torch.randn(v_feats, filters)" analogues
    Wr = jax.random.normal(kwr, (v_feats, filters), dtype=jnp.float32)
    Wnr = jax.random.normal(kwnr, (v_feats, filters), dtype=jnp.float32)

    params = prepare_weights(Wr, Wnr)    # hoisted weight padding (once per weight set)
    x = ((Z0, nb0), (Z1, nb1))
    (out0, rnb0), (out1, rnb1) = gnn_layer(x, params)
    jax.block_until_ready(out0)
    jax.block_until_ready(out1)

    ref0 = _ref_protein(Z0, nb0, Wr, Wnr)
    ref1 = _ref_protein(Z1, nb1, Wr, Wnr)
    np.testing.assert_allclose(np.asarray(out0), np.asarray(ref0), rtol=1e-3, atol=1e-3)
    np.testing.assert_allclose(np.asarray(out1), np.asarray(ref1), rtol=1e-3, atol=1e-3)
    assert np.array_equal(np.asarray(rnb0), np.asarray(nb0))
    assert np.array_equal(np.asarray(rnb1), np.asarray(nb1))

    print("KERNEL_OK")
</pallas_src>

<mosaic_0001>
module attributes {stable_mosaic.version = 11 : i64} {
  func.func @_gnn_kernel(%arg0: i32, %arg1: i32, %arg2: i32, %arg3: memref<1x64x10xi32, #tpu.memory_space<vmem>>, %arg4: memref<1x64x32xbf16, #tpu.memory_space<vmem>>, %arg5: memref<1x64x32xbf16, #tpu.memory_space<vmem>>, %arg6: memref<32x128xbf16, #tpu.memory_space<vmem>>, %arg7: memref<32x128xf32, #tpu.memory_space<vmem>>, %arg8: memref<1x64x128xf32, #tpu.memory_space<vmem>>, %arg9: memref<64x32xf32, #tpu.memory_space<vmem>>) attributes {dimension_semantics = [#tpu.dimension_semantics<parallel>, #tpu.dimension_semantics<parallel>, #tpu.dimension_semantics<arbitrary>], iteration_bounds = array<i64: 2, 1, 1>, scalar_prefetch = 0 : i64, scratch_operands = 1 : i64, tpu.core_type = #tpu.core_type<tc>, window_params = [{transform_indices = @transform_0, window_bounds = array<i64: 1, 64, 10>}, {transform_indices = @transform_1, window_bounds = array<i64: 1, 64, 32>}, {transform_indices = @transform_2, window_bounds = array<i64: 1, 64, 32>}, {pipeline_mode = #tpu.pipeline_mode<synchronous>, transform_indices = @transform_3, window_bounds = array<i64: 32, 128>}, {pipeline_mode = #tpu.pipeline_mode<synchronous>, transform_indices = @transform_4, window_bounds = array<i64: 32, 128>}, {transform_indices = @transform_5, window_bounds = array<i64: 1, 64, 128>}]} {
    %c0_i32 = arith.constant 0 : i32
    %0 = arith.cmpi eq, %arg2, %c0_i32 : i32
    %1 = arith.extui %0 : i1 to i32
    %c0_i32_0 = arith.constant 0 : i32
    %2 = arith.cmpi ne, %1, %c0_i32_0 : i32
    scf.if %2 {
      %cst_13 = arith.constant 0.000000e+00 : f32
      %80 = vector.broadcast %cst_13 : f32 to vector<64x32xf32>
      %c0_14 = arith.constant 0 : index
      %c0_15 = arith.constant 0 : index
      %81 = vector.load %arg9[%c0_14, %c0_15] : memref<64x32xf32, #tpu.memory_space<vmem>>, vector<64x32xf32>
      tpu.vector_store %arg9[%c0_14, %c0_15], %80 {strides = array<i32>} : memref<64x32xf32, #tpu.memory_space<vmem>>, vector<64x32xf32>,
    } else {
    }
    %c0 = arith.constant 0 : index
    %c0_1 = arith.constant 0 : index
    %c0_2 = arith.constant 0 : index
    %3 = vector.load %arg3[%c0, %c0_1, %c0_2] : memref<1x64x10xi32, #tpu.memory_space<vmem>>, vector<1x64x10xi32>
    %4 = vector.shape_cast %3 : vector<1x64x10xi32> to vector<64x10xi32>
    %c64_i32 = arith.constant 64 : i32
    %5 = arith.muli %arg2, %c64_i32 : i32
    %6 = vector.broadcast %5 : i32 to vector<64x10xi32>
    %7 = arith.subi %4, %6 : vector<64x10xi32>
    %8 = tpu.iota {dimensions = array<i32: 1>} : vector<64x64xi32>
    %cst = arith.constant 0.000000e+00 : f32
    %9 = vector.broadcast %cst : f32 to vector<64x64xf32>
    %10 = vector.extract_strided_slice %7 {offsets = [0, 0], sizes = [64, 1], strides = [1, 1]} : vector<64x10xi32> to vector<64x1xi32>
    %11 = vector.broadcast %10 : vector<64x1xi32> to vector<64x64xi32>
    %12 = arith.cmpi eq, %8, %11 : vector<64x64xi32>
    %13 = arith.extui %12 : vector<64x64xi1> to vector<64x64xi32>
    %14 = arith.sitofp %13 : vector<64x64xi32> to vector<64x64xf32>
    %15 = arith.addf %9, %14 : vector<64x64xf32>
    %16 = vector.extract_strided_slice %7 {offsets = [0, 1], sizes = [64, 1], strides = [1, 1]} : vector<64x10xi32> to vector<64x1xi32>
    %17 = vector.broadcast %16 : vector<64x1xi32> to vector<64x64xi32>
    %18 = arith.cmpi eq, %8, %17 : vector<64x64xi32>
    %19 = arith.extui %18 : vector<64x64xi1> to vector<64x64xi32>
    %20 = arith.sitofp %19 : vector<64x64xi32> to vector<64x64xf32>
    %21 = arith.addf %15, %20 : vector<64x64xf32>
    %22 = vector.extract_strided_slice %7 {offsets = [0, 2], sizes = [64, 1], strides = [1, 1]} : vector<64x10xi32> to vector<64x1xi32>
    %23 = vector.broadcast %22 : vector<64x1xi32> to vector<64x64xi32>
    %24 = arith.cmpi eq, %8, %23 : vector<64x64xi32>
    %25 = arith.extui %24 : vector<64x64xi1> to vector<64x64xi32>
    %26 = arith.sitofp %25 : vector<64x64xi32> to vector<64x64xf32>
    %27 = arith.addf %21, %26 : vector<64x64xf32>
    %28 = vector.extract_strided_slice %7 {offsets = [0, 3], sizes = [64, 1], strides = [1, 1]} : vector<64x10xi32> to vector<64x1xi32>
    %29 = vector.broadcast %28 : vector<64x1xi32> to vector<64x64xi32>
    %30 = arith.cmpi eq, %8, %29 : vector<64x64xi32>
    %31 = arith.extui %30 : vector<64x64xi1> to vector<64x64xi32>
    %32 = arith.sitofp %31 : vector<64x64xi32> to vector<64x64xf32>
    %33 = arith.addf %27, %32 : vector<64x64xf32>
    %34 = vector.extract_strided_slice %7 {offsets = [0, 4], sizes = [64, 1], strides = [1, 1]} : vector<64x10xi32> to vector<64x1xi32>
    %35 = vector.broadcast %34 : vector<64x1xi32> to vector<64x64xi32>
    %36 = arith.cmpi eq, %8, %35 : vector<64x64xi32>
    %37 = arith.extui %36 : vector<64x64xi1> to vector<64x64xi32>
    %38 = arith.sitofp %37 : vector<64x64xi32> to vector<64x64xf32>
    %39 = arith.addf %33, %38 : vector<64x64xf32>
    %40 = vector.extract_strided_slice %7 {offsets = [0, 5], sizes = [64, 1], strides = [1, 1]} : vector<64x10xi32> to vector<64x1xi32>
    %41 = vector.broadcast %40 : vector<64x1xi32> to vector<64x64xi32>
    %42 = arith.cmpi eq, %8, %41 : vector<64x64xi32>
    %43 = arith.extui %42 : vector<64x64xi1> to vector<64x64xi32>
    %44 = arith.sitofp %43 : vector<64x64xi32> to vector<64x64xf32>
    %45 = arith.addf %39, %44 : vector<64x64xf32>
    %46 = vector.extract_strided_slice %7 {offsets = [0, 6], sizes = [64, 1], strides = [1, 1]} : vector<64x10xi32> to vector<64x1xi32>
    %47 = vector.broadcast %46 : vector<64x1xi32> to vector<64x64xi32>
    %48 = arith.cmpi eq, %8, %47 : vector<64x64xi32>
    %49 = arith.extui %48 : vector<64x64xi1> to vector<64x64xi32>
    %50 = arith.sitofp %49 : vector<64x64xi32> to vector<64x64xf32>
    %51 = arith.addf %45, %50 : vector<64x64xf32>
    %52 = vector.extract_strided_slice %7 {offsets = [0, 7], sizes = [64, 1], strides = [1, 1]} : vector<64x10xi32> to vector<64x1xi32>
    %53 = vector.broadcast %52 : vector<64x1xi32> to vector<64x64xi32>
    %54 = arith.cmpi eq, %8, %53 : vector<64x64xi32>
    %55 = arith.extui %54 : vector<64x64xi1> to vector<64x64xi32>
    %56 = arith.sitofp %55 : vector<64x64xi32> to vector<64x64xf32>
    %57 = arith.addf %51, %56 : vector<64x64xf32>
    %58 = vector.extract_strided_slice %7 {offsets = [0, 8], sizes = [64, 1], strides = [1, 1]} : vector<64x10xi32> to vector<64x1xi32>
    %59 = vector.broadcast %58 : vector<64x1xi32> to vector<64x64xi32>
    %60 = arith.cmpi eq, %8, %59 : vector<64x64xi32>
    %61 = arith.extui %60 : vector<64x64xi1> to vector<64x64xi32>
    %62 = arith.sitofp %61 : vector<64x64xi32> to vector<64x64xf32>
    %63 = arith.addf %57, %62 : vector<64x64xf32>
    %64 = vector.extract_strided_slice %7 {offsets = [0, 9], sizes = [64, 1], strides = [1, 1]} : vector<64x10xi32> to vector<64x1xi32>
    %65 = vector.broadcast %64 : vector<64x1xi32> to vector<64x64xi32>
    %66 = arith.cmpi eq, %8, %65 : vector<64x64xi32>
    %67 = arith.extui %66 : vector<64x64xi1> to vector<64x64xi32>
    %68 = arith.sitofp %67 : vector<64x64xi32> to vector<64x64xf32>
    %69 = arith.addf %63, %68 : vector<64x64xf32>
    %c0_3 = arith.constant 0 : index
    %c0_4 = arith.constant 0 : index
    %70 = vector.load %arg9[%c0_3, %c0_4] : memref<64x32xf32, #tpu.memory_space<vmem>>, vector<64x32xf32>
    %71 = arith.truncf %69 : vector<64x64xf32> to vector<64x64xbf16>
    %c0_5 = arith.constant 0 : index
    %c0_6 = arith.constant 0 : index
    %c0_7 = arith.constant 0 : index
    %72 = vector.load %arg5[%c0_5, %c0_6, %c0_7] : memref<1x64x32xbf16, #tpu.memory_space<vmem>>, vector<1x64x32xbf16>
    %73 = vector.shape_cast %72 : vector<1x64x32xbf16> to vector<64x32xbf16>
    %cst_8 = arith.constant dense<0.000000e+00> : vector<64x32xf32>
    %74 = tpu.matmul %71, %73, %cst_8 {dimension_numbers = #tpu.dot_dimension_numbers<[1], [0], [0], [1], [0, 0, 1, 1], [], []>} : vector<64x64xbf16>, vector<64x32xbf16>, vector<64x32xf32> -> vector<64x32xf32>
    %75 = arith.addf %70, %74 : vector<64x32xf32>
    %c0_9 = arith.constant 0 : index
    %c0_10 = arith.constant 0 : index
    %76 = vector.load %arg9[%c0_9, %c0_10] : memref<64x32xf32, #tpu.memory_space<vmem>>, vector<64x32xf32>
    tpu.vector_store %arg9[%c0_9, %c0_10], %75 {strides = array<i32>} : memref<64x32xf32, #tpu.memory_space<vmem>>, vector<64x32xf32>,
    %c0_i32_11 = arith.constant 0 : i32
    %77 = arith.cmpi eq, %arg2, %c0_i32_11 : i32
    %78 = arith.extui %77 : i1 to i32
    %c0_i32_12 = arith.constant 0 : i32
    %79 = arith.cmpi ne, %78, %c0_i32_12 : i32
    scf.if %79 {
      %c-1_i32 = arith.constant -1 : i32
      %80 = vector.broadcast %c-1_i32 : i32 to vector<64x10xi32>
      %81 = arith.cmpi sgt, %4, %80 : vector<64x10xi32>
      %82 = arith.extui %81 : vector<64x10xi1> to vector<64x10xi32>
      %83 = arith.sitofp %82 : vector<64x10xi32> to vector<64x10xf32>
      %cst_13 = arith.constant dense<0.000000e+00> : vector<64xf32>
      %84 = vector.multi_reduction <add>, %83, %cst_13 [1] : vector<64x10xf32> to vector<64xf32>
      %85 = vector.shape_cast %84 : vector<64xf32> to vector<64x1xf32>
      %cst_14 = arith.constant 0.000000e+00 : f32
      %86 = vector.broadcast %cst_14 : f32 to vector<64x1xf32>
      %87 = arith.cmpf oeq, %85, %86 : vector<64x1xf32>
      %cst_15 = arith.constant 1.000000e+00 : f32
      %88 = vector.broadcast %cst_15 : f32 to vector<64x1xf32>
      %89 = arith.select %87, %88, %85 : vector<64x1xi1>, vector<64x1xf32>
      %90 = tpu.reciprocal %89 : vector<64x1xf32> -> vector<64x1xf32>
      %c0_16 = arith.constant 0 : index
      %c0_17 = arith.constant 0 : index
      %91 = vector.load %arg9[%c0_16, %c0_17] : memref<64x32xf32, #tpu.memory_space<vmem>>, vector<64x32xf32>
      %92 = vector.broadcast %90 : vector<64x1xf32> to vector<64x32xf32>
      %93 = arith.mulf %91, %92 : vector<64x32xf32>
      %c0_18 = arith.constant 0 : index
      %c0_19 = arith.constant 0 : index
      %c0_20 = arith.constant 0 : index
      %94 = vector.load %arg4[%c0_18, %c0_19, %c0_20] : memref<1x64x32xbf16, #tpu.memory_space<vmem>>, vector<1x64x32xbf16>
      %95 = vector.shape_cast %94 : vector<1x64x32xbf16> to vector<64x32xbf16>
      %c0_21 = arith.constant 0 : index
      %c0_22 = arith.constant 0 : index
      %96 = vector.load %arg6[%c0_21, %c0_22] : memref<32x128xbf16, #tpu.memory_space<vmem>>, vector<32x128xbf16>
      %cst_23 = arith.constant dense<0.000000e+00> : vector<64x128xf32>
      %97 = tpu.matmul %95, %96, %cst_23 {dimension_numbers = #tpu.dot_dimension_numbers<[1], [0], [0], [1], [0, 0, 1, 1], [], []>} : vector<64x32xbf16>, vector<32x128xbf16>, vector<64x128xf32> -> vector<64x128xf32>
      %c0_24 = arith.constant 0 : index
      %c0_25 = arith.constant 0 : index
      %98 = vector.load %arg7[%c0_24, %c0_25] : memref<32x128xf32, #tpu.memory_space<vmem>>, vector<32x128xf32>
      %cst_26 = arith.constant dense<0.000000e+00> : vector<64x128xf32>
      %99 = tpu.matmul %93, %98, %cst_26 {dimension_numbers = #tpu.dot_dimension_numbers<[1], [0], [0], [1], [0, 0, 1, 1], [], []>} : vector<64x32xf32>, vector<32x128xf32>, vector<64x128xf32> -> vector<64x128xf32>
      %100 = arith.addf %97, %99 : vector<64x128xf32>
      %cst_27 = arith.constant 0.000000e+00 : f32
      %101 = vector.broadcast %cst_27 : f32 to vector<64x128xf32>
      %102 = arith.maximumf %100, %101 : vector<64x128xf32>
      %c0_28 = arith.constant 0 : index
      %c0_29 = arith.constant 0 : index
      %c0_30 = arith.constant 0 : index
      %103 = vector.load %arg8[%c0_28, %c0_29, %c0_30] : memref<1x64x128xf32, #tpu.memory_space<vmem>>, vector<1x64x128xf32>
      %104 = vector.shape_cast %103 : vector<1x64x128xf32> to vector<64x128xf32>
      %105 = vector.shape_cast %102 : vector<64x128xf32> to vector<1x64x128xf32>
      tpu.vector_store %arg8[%c0_28, %c0_29, %c0_30], %105 {strides = array<i32>} : memref<1x64x128xf32, #tpu.memory_space<vmem>>, vector<1x64x128xf32>,
    } else {
    }
    return
  }
  func.func @transform_0(%arg0: i32, %arg1: i32, %arg2: i32) -> (i32, i32, i32) {
    %c0_i32 = arith.constant 0 : i32
    %c0_i32_0 = arith.constant 0 : i32
    return %arg0, %arg1, %c0_i32 : i32, i32, i32
  }
  func.func @transform_1(%arg0: i32, %arg1: i32, %arg2: i32) -> (i32, i32, i32) {
    %c0_i32 = arith.constant 0 : i32
    %c0_i32_0 = arith.constant 0 : i32
    return %arg0, %arg1, %c0_i32 : i32, i32, i32
  }
  func.func @transform_2(%arg0: i32, %arg1: i32, %arg2: i32) -> (i32, i32, i32) {
    %c0_i32 = arith.constant 0 : i32
    %c0_i32_0 = arith.constant 0 : i32
    return %arg0, %arg2, %c0_i32 : i32, i32, i32
  }
  func.func @transform_3(%arg0: i32, %arg1: i32, %arg2: i32) -> (i32, i32) {
    %c0_i32 = arith.constant 0 : i32
    %c0_i32_0 = arith.constant 0 : i32
    %c0_i32_1 = arith.constant 0 : i32
    return %c0_i32, %c0_i32_0 : i32, i32
  }
  func.func @transform_4(%arg0: i32, %arg1: i32, %arg2: i32) -> (i32, i32) {
    %c0_i32 = arith.constant 0 : i32
    %c0_i32_0 = arith.constant 0 : i32
    %c0_i32_1 = arith.constant 0 : i32
    return %c0_i32, %c0_i32_0 : i32, i32
  }
  func.func @transform_5(%arg0: i32, %arg1: i32, %arg2: i32) -> (i32, i32, i32) {
    %c0_i32 = arith.constant 0 : i32
    %c0_i32_0 = arith.constant 0 : i32
    return %arg0, %arg1, %c0_i32 : i32, i32, i32
  }
}

</mosaic_0001>

<bundles_post_ra>
// kernel: _gnn_forward.1
= control target key start
LH: loop header
LB: loop body
LE: loop exit
PB: predicated region body
PF: predicated region fallthrough
CT: control target
= control target key end

     0   :  { %s1952_s18 = smov 0   ;;  %s1954_s19 = smov 0   ;;  %s2494_s0 = inlined_call_operand.vmem [shape: s32[2,64,10], index: 0, kind: input, shape index: {}]   ;;  %s2495_s1 = inlined_call_operand.vmem [shape: bf16[2,64,32], index: 1, kind: input, shape index: {}, may-alias: {1,2}]   ;;  %s2496_s2 = inlined_call_operand.vmem [shape: bf16[2,64,32], index: 2, kind: input, shape index: {}, may-alias: {1,2}]   ;;  %s2497_s3 = inlined_call_operand.vmem [shape: bf16[32,128], index: 3, kind: input, shape index: {}]   ;;  %s2498_s4 = inlined_call_operand.vmem [shape: f32[32,128], index: 4, kind: input, shape index: {}]   ;;  %s2499_s5 = inlined_call_operand.vmem [shape: f32[2,64,128], index: 5, kind: output, shape index: {}]  }
   0x1   :  { %s1956_s20 = smov 0  }
   0x2 LB: > { %s34_s21 = sadd.s32 1, %s1905_s19  ;;  %p1568_p0 = scmp.ge.s32.totalorder %s1909_s20, 1  ;;  %s1909_s20 = sphi %s1956_s20, %s15_s20   ;;  %s1905_s19 = sphi %s1954_s19, %s2501_s19   ;;  %s1901_s18 = sphi %s1952_s18, %s2500_s18  }
   0x3   : > { %p36_p1 = scmp.ge.s32.totalorder %s34_s21, 2  ;;  %p249_p2 = scmp.lt.s32.totalorder %s1909_s20, 3 }
   0x5   : > { %s2503_s21 = smov (%p36_p1, %s34_s21), 0  ;;  %p250_p3 = pnand %p1568_p0, %p249_p2 }
   0x6   : > { %p304_p4 = scmp.lt.s32.totalorder (!%p250_p3), %s1901_s18, 1  ;;  %v1911_v0 = vmov (!%p250_p3), 1   ;;  %v1912_v1 = vmov (!%p250_p3), 0   ;;  %v1913_v8 = vmov (!%p250_p3), 2   ;;  %v1914_v11 = vmov (!%p250_p3), 3  }
   0x7   : > { %253 = sbr.rel (%p250_p3) target bundleno = 842 (0x34a), region = 40  ;;  %1819 = vset.pattern.permute.xlu1 (!%p250_p3), %v1911_v0  ;;  %1818 = vset.pattern.permute.xlu0 (!%p250_p3), %v1912_v1  ;;  %v1915_v12 = vmov (!%p250_p3), 4   ;;  %v1916_v13 = vmov (!%p250_p3), 5   ;;  %v1917_v14 = vmov (!%p250_p3), 9   ;;  %v1918_v15 = vmov (!%p250_p3), 6  }
   0x8   : > { %v1919_v16 = vmov (!%p250_p3), 7   ;;  %v1920_v17 = vmov (!%p250_p3), 8   ;;  %v375_v22 = vlaneseq (!%p250_p3)  ;;  %v1921_v29 = vmov (!%p250_p3), 0.0  }
   0xa   : > { %v2087_v25 = vand.u32 (!%p250_p3), 127, %v375_v22 }
   0xe   : > { %s2505_s18 = smov (!%p304_p4, %s1901_s18), 1 }
   0xf   : > { %s1693_s22 = sshll.u32 %s2505_s18, 6  ;;  %s1694_s26 = sshll.u32 %s2505_s18, 5 }
  0x10   : > { %s311_s25 = scalar_lea.vmem %s2494_s0, %s1693_s22  ;;  %s2145_s29 = scalar_lea.vmem %s2496_s2, %s1694_s26 }
  0x11   : > { %v1980_v2 = vld [vmem:[%s311_s25] sm:$0xff]  ;;  %v1984_v3 = vld [vmem:[%s311_s25 + $0x8] sm:$0xff]  ;;  %v1988_v4 = vld [vmem:[%s311_s25 + $0x10] sm:$0xff]  ;;  %s2158_s7 = scalar_lea.vmem %s2495_s1, %s1694_s26  ;;  %s341_s27 = scalar_lea.vmem %s2499_s5, %s1693_s22 }
  0x12   : > { %434 = vperm.xlu1 %1819, %v1980_v2   ;;  %378 = vperm.xlu0 %1818, %v1980_v2   ;;  %v1990_v5 = vld [vmem:[%s311_s25 + $0x18] sm:$0xff]  ;;  %v1995_v6 = vld [vmem:[%s311_s25 + $0x20] sm:$0xff]  ;;  %v1999_v7 = vld [vmem:[%s311_s25 + $0x30] sm:$0xff] }
  0x13   : > { %v2007_v9 = vld [vmem:[%s311_s25 + $0x28] sm:$0xff]  ;;  %v2011_v10 = vld [vmem:[%s311_s25 + $0x38] sm:$0xff]  ;;  %v1861_v63 = vld [vmem:[%s2145_s29] sm:$0xff]  }
  0x14   : > { %1723 = vmatprep.subr.bf16.mxu0 %v1861_v63 }
  0x15   : > { %1724 = vmatpush3.bf16.msra.mxu0 %v1861_v63 }
  0x16   : > { %437 = vperm.xlu1 %1819, %v1984_v3   ;;  %381 = vperm.xlu0 %1818, %v1984_v3  }
  0x1a   : > { %1820 = vset.pattern.permute.xlu1 %v1912_v1  ;;  %384 = vperm.xlu0 %1818, %v1988_v4  }
  0x1b   : > { %387 = vperm.xlu1 %1820, %v1990_v5  }
  0x1e   : > { %390 = vperm.xlu0 %1818, %v1995_v6  }
  0x1f   : > { %1821 = vset.pattern.permute.xlu1 %v1911_v0 }
  0x20   : > { %443 = vperm.xlu1 %1821, %v1990_v5  }
  0x22   : > { %396 = vperm.xlu0 %1818, %v1999_v7  }
  0x24   : > { %1822 = vset.pattern.permute.xlu1 %v1913_v8 }
  0x25   : > { %490 = vperm.xlu1 %1822, %v1980_v2  }
  0x26   : > { %1828 = vset.pattern.permute.xlu0 %v1911_v0 }
  0x27   : > { %440 = vperm.xlu0 %1828, %v1988_v4  }
  0x29   : > { %496 = vperm.xlu1 %1822, %v1988_v4  }
  0x2b   : > { %449 = vperm.xlu0 %1828, %v2007_v9  }
  0x2d   : > { %499 = vperm.xlu1 %1822, %v1990_v5  }
  0x2f   : > { %455 = vperm.xlu0 %1828, %v2011_v10  }
  0x31   : > { %1823 = vset.pattern.permute.xlu1 %v1914_v11 }
  0x32   : > { %549 = vperm.xlu1 %1823, %v1984_v3  }
  0x33   : > { %1831 = vset.pattern.permute.xlu0 %v1913_v8 }
  0x34   : > { %493 = vperm.xlu0 %1831, %v1984_v3  }
  0x36   : > { %552 = vperm.xlu1 %1823, %v1988_v4  }
  0x38   : > { %502 = vperm.xlu0 %1831, %v1995_v6  }
  0x3a   : > { %1824 = vset.pattern.permute.xlu1 %v1915_v12 }
  0x3b   : > { %602 = vperm.xlu1 %1824, %v1980_v2  }
  0x3c   : > { %1833 = vset.pattern.permute.xlu0 %v1914_v11 }
  0x3d   : > { %546 = vperm.xlu0 %1833, %v1980_v2  }
  0x3f   : > { %608 = vperm.xlu1 %1824, %v1988_v4  }
  0x41   : > { %555 = vperm.xlu0 %1833, %v1990_v5  }
  0x43   : > { %611 = vperm.xlu1 %1824, %v1990_v5  }
  0x45   : > { %558 = vperm.xlu0 %1833, %v1995_v6  }
  0x47   : > { %1825 = vset.pattern.permute.xlu1 %v1912_v1 }
  0x48   : > { %393 = vperm.xlu1 %1825, %v2007_v9  }
  0x49   : > { %1838 = vset.pattern.permute.xlu0 %v1915_v12 }
  0x4a   : > { %605 = vperm.xlu0 %1838, %v1984_v3  }
  0x4c   : > { %1826 = vset.pattern.permute.xlu1 %v1911_v0 }
  0x4d   : > { %446 = vperm.xlu1 %1826, %v1995_v6  }
  0x4e   : > { %614 = vperm.xlu0 %1838, %v1995_v6  }
  0x51   : > { %1827 = vset.pattern.permute.xlu1 %v1916_v13 }
  0x52   : > { %658 = vperm.xlu1 %1827, %v1980_v2   ;;  %1847 = vset.pattern.permute.xlu0 %v1916_v13 }
  0x53   : > { %670 = vperm.xlu0 %1847, %v1995_v6  }
  0x56   : > { %661 = vperm.xlu1 %1827, %v1984_v3  }
  0x57   : > { %1850 = vset.pattern.permute.xlu0 %v1917_v14 }
  0x58   : > { %885 = vperm.xlu0 %1850, %v1984_v3  }
  0x5a   : > { %1829 = vset.pattern.permute.xlu1 %v1912_v1 }
  0x5b   : > { %399 = vperm.xlu1 %1829, %v2011_v10  }
  0x5c   : > { %888 = vperm.xlu0 %1850, %v1988_v4  }
  0x5f   : > { %1830 = vset.pattern.permute.xlu1 %v1911_v0 }
  0x60   : > { %452 = vperm.xlu1 %1830, %v1999_v7   ;;  %1852 = vset.pattern.permute.xlu0 %v1918_v15 }
  0x61   : > { %717 = vperm.xlu0 %1852, %v1984_v3  }
  0x64   : > { %1832 = vset.pattern.permute.xlu1 %v1916_v13 }
  0x65   : > { %664 = vperm.xlu1 %1832, %v1988_v4   ;;  %720 = vperm.xlu0 %1852, %v1988_v4  }
  0x69   : > { %667 = vperm.xlu1 %1832, %v1990_v5   ;;  %726 = vperm.xlu0 %1852, %v1995_v6  }
  0x6d   : > { %1834 = vset.pattern.permute.xlu1 %v1913_v8  ;;  %735 = vperm.xlu0 %1852, %v2011_v10  }
  0x6e   : > { %505 = vperm.xlu1 %1834, %v2007_v9  }
  0x71   : > { %1855 = vset.pattern.permute.xlu0 %v1919_v16 }
  0x72   : > { %1835 = vset.pattern.permute.xlu1 %v1918_v15  ;;  %773 = vperm.xlu0 %1855, %v1984_v3  }
  0x73   : > { %714 = vperm.xlu1 %1835, %v1980_v2  }
  0x76   : > { %776 = vperm.xlu0 %1855, %v1988_v4  }
  0x77   : > { %1836 = vset.pattern.permute.xlu1 %v1913_v8 }
  0x78   : > { %508 = vperm.xlu1 %1836, %v1999_v7  }
  0x7a   : > { %785 = vperm.xlu0 %1855, %v2007_v9  }
  0x7c   : > { %511 = vperm.xlu1 %1836, %v2011_v10  }
  0x7e   : > { %1857 = vset.pattern.permute.xlu0 %v1920_v17 }
  0x7f   : > { %829 = vperm.xlu0 %1857, %v1984_v3  }
  0x80   : > { %1837 = vset.pattern.permute.xlu1 %v1918_v15 }
  0x81   : > { %723 = vperm.xlu1 %1837, %v1990_v5  }
  0x83   : > { %832 = vperm.xlu0 %1857, %v1988_v4  }
  0x85   : > { %1839 = vset.pattern.permute.xlu1 %v1914_v11 }
  0x86   : > { %561 = vperm.xlu1 %1839, %v2007_v9  }
  0x87   : > { %838 = vperm.xlu0 %1857, %v1995_v6  }
  0x8a   : > { %1840 = vset.pattern.permute.xlu1 %v1919_v16 }
  0x8b   : > { %770 = vperm.xlu1 %1840, %v1980_v2   ;;  %847 = vperm.xlu0 %1857, %v2011_v10  }
  0x8f   : > { %1841 = vset.pattern.permute.xlu1 %v1914_v11  ;;  %1860 = vset.pattern.permute.xlu0 %v1917_v14 }
  0x90   : > { %564 = vperm.xlu1 %1841, %v1999_v7   ;;  %897 = vperm.xlu0 %1860, %v2007_v9  }
  0x91   : > { %v435_v18 = vpop.permute.xlu1 %434  ;;  %v379_v19 = vpop.permute.xlu0 %378 }
  0x92   : > { %vm457_vm0 = vcmp.eq.s32.totalorder %v2087_v25, %v435_v18  ;;  %vm401_vm1 = vcmp.eq.s32.totalorder %v2087_v25, %v379_v19 }
  0x93   : > { %v1585_v30 = vsel %vm457_vm0, 1.0, %v1921_v29  ;;  %v1577_v31 = vsel %vm401_vm1, 1.0, %v1921_v29 }
  0x94   : > { %567 = vperm.xlu1 %1841, %v2011_v10   ;;  %v481_v33 = vadd.f32 %v1585_v30, %v1577_v31 }
  0x95   : > { %v438_v20 = vpop.permute.xlu1 %437  ;;  %v382_v21 = vpop.permute.xlu0 %381 }
  0x96   : > { %vm458_vm6 = vcmp.eq.s32.totalorder %v2087_v25, %v438_v20  ;;  %vm402_vm7 = vcmp.eq.s32.totalorder %v2087_v25, %v382_v21 }
  0x97   : > { %v1586_v46 = vsel %vm458_vm6, 1.0, %v1921_v29  ;;  %v1578_v47 = vsel %vm402_vm7, 1.0, %v1921_v29 }
  0x98   : > { %1842 = vset.pattern.permute.xlu1 %v1919_v16  ;;  %v482_v50 = vadd.f32 %v1586_v46, %v1578_v47 }
  0x99   : > { %779 = vperm.xlu1 %1842, %v1990_v5   ;;  %v385_v23 = vpop.permute.xlu0 %384 }
  0x9a   : > { %v2085_v24 = vpop.permute.xlu1 %387  ;;  %vm403_vm2 = vcmp.eq.s32.totalorder %v2087_v25, %v385_v23  ;;  %v1862_v23 = vld [vmem:[%s2145_s29 + $0x8] sm:$0xff]  }
  0x9b   : > { %v1579_v34 = vsel %vm403_vm2, 1.0, %v1921_v29  ;;  %vm404_vm12 = vcmp.eq.s32.totalorder %v2087_v25, %v2085_v24  ;;  %1725 = vmatprep.subr.bf16.mxu0 %v1862_v23 }
  0x9c   : > { %v1580_v62 = vsel %vm404_vm12, 1.0, %v1921_v29  ;;  %1726 = vmatpush3.bf16.msra.mxu0 %v1862_v23 }
  0x9d   : > { %1843 = vset.pattern.permute.xlu1 %v1915_v12  ;;  %v2090_v26 = vpop.permute.xlu0 %390 }
  0x9e   : > { %617 = vperm.xlu1 %1843, %v2007_v9  }
  0x9f   : > { %v444_v27 = vpop.permute.xlu1 %443 }
  0xa0   : > { %vm460_vm11 = vcmp.eq.s32.totalorder %v2087_v25, %v444_v27 }
  0xa1   : > { %v2095_v28 = vpop.permute.xlu0 %396  ;;  %v1588_v60 = vsel %vm460_vm11, 1.0, %v1921_v29 }
  0xa2   : > { %1844 = vset.pattern.permute.xlu1 %v1920_v17  ;;  %v484_v11 = vadd.f32 %v1588_v60, %v1580_v62 }
  0xa3   : > { %826 = vperm.xlu1 %1844, %v1980_v2  }
  0xa4   : > { %v491_v32 = vpop.permute.xlu1 %490 }
  0xa5   : > { %vm513_vm3 = vcmp.eq.s32.totalorder %v2087_v25, %v491_v32 }
  0xa6   : > { %v1593_v35 = vsel %vm513_vm3, 1.0, %v1921_v29  ;;  %v441_v36 = vpop.permute.xlu0 %440 }
  0xa7   : > { %v537_v37 = vadd.f32 %v1593_v35, %v481_v33  ;;  %vm459_vm4 = vcmp.eq.s32.totalorder %v2087_v25, %v441_v36  ;;  %1845 = vset.pattern.permute.xlu1 %v1915_v12 }
  0xa8   : > { %v1587_v38 = vsel %vm459_vm4, 1.0, %v1921_v29  ;;  %620 = vperm.xlu1 %1845, %v1999_v7   ;;  %v497_v39 = vpop.permute.xlu1 %496 }
  0xa9   : > { %v483_v40 = vadd.f32 %v1587_v38, %v1579_v34  ;;  %vm515_vm5 = vcmp.eq.s32.totalorder %v2087_v25, %v497_v39  ;;  %v1863_v34 = vld [vmem:[%s2145_s29 + $0x10] sm:$0xff]   ;;  %v1864_v39 = vld [vmem:[%s2145_s29 + $0x18] sm:$0xff]  }
  0xaa   : > { %v1595_v41 = vsel %vm515_vm5, 1.0, %v1921_v29  ;;  %v2111_v42 = vpop.permute.xlu0 %449  ;;  %1727 = vmatprep.subr.bf16.mxu0 %v1863_v34  ;;  %vm405_vm5 = vcmp.eq.s32.totalorder %v2087_v25, %v2090_v26 }
  0xab   : > { %v539_v43 = vadd.f32 %v1595_v41, %v483_v40  ;;  %vm462_vm3 = vcmp.eq.s32.totalorder %v2087_v25, %v2111_v42  ;;  %1728 = vmatpush3.bf16.msra.mxu0 %v1863_v34  ;;  %v1581_v41 = vsel %vm405_vm5, 1.0, %v1921_v29 }
  0xac   : > { %623 = vperm.xlu1 %1845, %v2011_v10   ;;  %v500_v44 = vpop.permute.xlu1 %499  ;;  %v1590_v35 = vsel %vm462_vm3, 1.0, %v1921_v29  ;;  %1729 = vmatprep.subr.bf16.mxu0 %v1864_v39 }
  0xad   : > { %vm516_vm13 = vcmp.eq.s32.totalorder %v2087_v25, %v500_v44 }
  0xae   : > { %v2116_v45 = vpop.permute.xlu0 %455  ;;  %v1596_v0 = vsel %vm516_vm13, 1.0, %v1921_v29 }
  0xaf   : > { %v540_v21 = vadd.f32 %v1596_v0, %v484_v11  ;;  %1730 = vmatpush3.bf16.msra.mxu0 %v1864_v39 }
  0xb0   : > { %1846 = vset.pattern.permute.xlu1 %v1920_v17 }
  0xb1   : > { %835 = vperm.xlu1 %1846, %v1990_v5   ;;  %v550_v48 = vpop.permute.xlu1 %549 }
  0xb2   : > { %vm570_vm8 = vcmp.eq.s32.totalorder %v2087_v25, %v550_v48 }
  0xb3   : > { %v494_v49 = vpop.permute.xlu0 %493  ;;  %v1602_v54 = vsel %vm570_vm8, 1.0, %v1921_v29 }
  0xb4   : > { %vm514_vm9 = vcmp.eq.s32.totalorder %v2087_v25, %v494_v49 }
  0xb5   : > { %v1594_v51 = vsel %vm514_vm9, 1.0, %v1921_v29  ;;  %1848 = vset.pattern.permute.xlu1 %v1916_v13  ;;  %v553_v52 = vpop.permute.xlu1 %552 }
  0xb6   : > { %v538_v53 = vadd.f32 %v1594_v51, %v482_v50  ;;  %vm571_vm10 = vcmp.eq.s32.totalorder %v2087_v25, %v553_v52  ;;  %673 = vperm.xlu1 %1848, %v2007_v9  }
  0xb7   : > { %v1603_v55 = vsel %vm571_vm10, 1.0, %v1921_v29  ;;  %v2130_v56 = vpop.permute.xlu0 %502 }
  0xb8   : > { %v595_v57 = vadd.f32 %v1603_v55, %v539_v43  ;;  %v2132_v58 = vadd.f32 %v1602_v54, %v538_v53  ;;  %vm517_vm6 = vcmp.eq.s32.totalorder %v2087_v25, %v2130_v56 }
  0xb9   : > { %v1597_v43 = vsel %vm517_vm6, 1.0, %v1921_v29 }
  0xba   : > { %1849 = vset.pattern.permute.xlu1 %v1917_v14  ;;  %v603_v59 = vpop.permute.xlu1 %602 }
  0xbb   : > { %882 = vperm.xlu1 %1849, %v1980_v2   ;;  %vm625_vm14 = vcmp.eq.s32.totalorder %v2087_v25, %v603_v59 }
  0xbc   : > { %v547_v61 = vpop.permute.xlu0 %546  ;;  %v1609_v18 = vsel %vm625_vm14, 1.0, %v1921_v29  ;;  %vm464_vm14 = vcmp.eq.s32.totalorder %v2087_v25, %v2116_v45 }
  0xbd   : > { %vm569_vm15 = vcmp.eq.s32.totalorder %v2087_v25, %v547_v61  ;;  %v1592_v0 = vsel %vm464_vm14, 1.0, %v1921_v29 }
  0xbe   : > { %v1601_v1 = vsel %vm569_vm15, 1.0, %v1921_v29  ;;  %v609_v8 = vpop.permute.xlu1 %608 }
  0xbf   : > { %v593_v12 = vadd.f32 %v1601_v1, %v537_v37  ;;  %vm627_vm0 = vcmp.eq.s32.totalorder %v2087_v25, %v609_v8  ;;  %1851 = vset.pattern.permute.xlu1 %v1916_v13 }
  0xc0   : > { %v1611_v19 = vsel %vm627_vm0, 1.0, %v1921_v29  ;;  %676 = vperm.xlu1 %1851, %v1999_v7   ;;  %v556_v20 = vpop.permute.xlu0 %555  ;;  %vm407_vm0 = vcmp.eq.s32.totalorder %v2087_v25, %v2095_v28 }
  0xc1   : > { %v2163_v22 = vadd.f32 %v1611_v19, %v595_v57  ;;  %vm572_vm1 = vcmp.eq.s32.totalorder %v2087_v25, %v556_v20  ;;  %v649_v13 = vadd.f32 %v1609_v18, %v593_v12  ;;  %v1583_v8 = vsel %vm407_vm0, 1.0, %v1921_v29 }
  0xc2   : > { %v1604_v24 = vsel %vm572_vm1, 1.0, %v1921_v29  ;;  %v612_v27 = vpop.permute.xlu1 %611  ;;  %vm1082_vm0 = vcmp.gt.s32.totalorder %v1990_v5, 4294967295 }
  0xc3   : > { %v596_v30 = vadd.f32 %v1604_v24, %v540_v21  ;;  %vm628_vm2 = vcmp.eq.s32.totalorder %v2087_v25, %v612_v27 }
  0xc4   : > { %v1612_v31 = vsel %vm628_vm2, 1.0, %v1921_v29  ;;  %679 = vperm.xlu1 %1851, %v2011_v10   ;;  %v559_v32 = vpop.permute.xlu0 %558 }
  0xc5   : > { %v2173_v33 = vadd.f32 %v1612_v31, %v596_v30  ;;  %vm573_vm7 = vcmp.eq.s32.totalorder %v2087_v25, %v559_v32 }
  0xc6   : > { %v1605_v47 = vsel %vm573_vm7, 1.0, %v1921_v29  ;;  %vm1081_vm7 = vcmp.gt.s32.totalorder %v1988_v4, 4294967295 }
  0xc7   : > { %v394_v36 = vpop.permute.xlu1 %393 }
  0xc8   : > { %vm406_vm4 = vcmp.eq.s32.totalorder %v2087_v25, %v394_v36  ;;  %1853 = vset.pattern.permute.xlu1 %v1917_v14 }
  0xc9   : > { %v1582_v37 = vsel %vm406_vm4, 1.0, %v1921_v29  ;;  %891 = vperm.xlu1 %1853, %v1990_v5   ;;  %v606_v38 = vpop.permute.xlu0 %605 }
  0xca   : > { %v2184_v40 = vadd.f32 %v1590_v35, %v1582_v37  ;;  %vm626_vm10 = vcmp.eq.s32.totalorder %v2087_v25, %v606_v38  ;;  %v1667_v38 = vsel %vm1081_vm7, 1.0, %v1921_v29 }
  0xcb   : > { %v1610_v51 = vsel %vm626_vm10, 1.0, %v1921_v29 }
  0xcc   : > { %v447_v42 = vpop.permute.xlu1 %446  ;;  %v650_v59 = vadd.f32 %v1610_v51, %v2132_v58 }
  0xcd   : > { %vm461_vm8 = vcmp.eq.s32.totalorder %v2087_v25, %v447_v42  ;;  %1854 = vset.pattern.permute.xlu1 %v1918_v15  ;;  %v615_v26 = vpop.permute.xlu0 %614 }
  0xce   : > { %v1589_v44 = vsel %vm461_vm8, 1.0, %v1921_v29  ;;  %729 = vperm.xlu1 %1854, %v2007_v9   ;;  %vm629_vm9 = vcmp.eq.s32.totalorder %v2087_v25, %v615_v26  ;;  %vm1103_vm8 = vcmask 80896  }
  0xcf   : > { %v485_v46 = vadd.f32 %v1589_v44, %v1581_v41  ;;  %v1613_v50 = vsel %vm629_vm9, 1.0, %v1921_v29  ;;  %vm1083_vm9 = vcmp.gt.s32.totalorder %v1995_v6, 4294967295  ;;  %v1110_v41 = vsel %vm1103_vm8, %v1667_v38, 0.0 }
  0xd0   : > { %v1669_v39 = vsel %vm1083_vm9, 1.0, %v1921_v29  ;;  %1111 = vadd.xlane.f32.xlu0 %v1110_v41  ;;  %vm348_vm9 = vcmask 261120  }
  0xd1   : > { %v541_v48 = vadd.f32 %v1597_v43, %v485_v46  ;;  %v659_v49 = vpop.permute.xlu1 %658  ;;  %v1116_v26 = vsel %vm1103_vm8, %v1669_v39, 0.0  ;;  %351 = vst.msk [vmem:[#allocation2 + $0x10] sm:$0xff] %vm348_vm9, %v1921_v29  ;;  %349 = vst.msk [vmem:[#allocation2] sm:$0xff] %vm348_vm9, %v1921_v29 }
  0xd2   : > { %vm681_vm11 = vcmp.eq.s32.totalorder %v2087_v25, %v659_v49  ;;  %732 = vperm.xlu1 %1854, %v1999_v7   ;;  %v671_v15 = vpop.permute.xlu0 %670  ;;  %350 = vst.msk [vmem:[#allocation2 + $0x8] sm:$0xff] %vm348_vm9, %v1921_v29  ;;  %352 = vst.msk [vmem:[#allocation2 + $0x18] sm:$0xff] %vm348_vm9, %v1921_v29 }
  0xd3   : > { %v597_v52 = vadd.f32 %v1605_v47, %v541_v48  ;;  %v1617_v53 = vsel %vm681_vm11, 1.0, %v1921_v29  ;;  %vm685_vm12 = vcmp.eq.s32.totalorder %v2087_v25, %v671_v15  ;;  %vm1084_vm11 = vcmp.gt.s32.totalorder %v2007_v9, 4294967295  ;;  %353 = vst.msk [vmem:[#allocation2 + $0x20] sm:$0xff] %vm348_vm9, %v1921_v29  ;;  %354 = vst.msk [vmem:[#allocation2 + $0x28] sm:$0xff] %vm348_vm9, %v1921_v29 }
  0xd4   : > { %v2204_v54 = vadd.f32 %v1617_v53, %v649_v13  ;;  %v1621_v55 = vsel %vm685_vm12, 1.0, %v1921_v29  ;;  %vm1086_vm12 = vcmp.gt.s32.totalorder %v2011_v10, 4294967295  ;;  %1117 = vadd.xlane.f32.xlu0 %v1116_v26  ;;  %v1668_v53 = vsel %vm1082_vm0, 1.0, %v1921_v29  ;;  %355 = vst.msk [vmem:[#allocation2 + $0x30] sm:$0xff] %vm348_vm9, %v1921_v29  ;;  %356 = vst.msk [vmem:[#allocation2 + $0x38] sm:$0xff] %vm348_vm9, %v1921_v29 }
  0xd5   : > { %v653_v56 = vadd.f32 %v1613_v50, %v597_v52  ;;  %v662_v57 = vpop.permute.xlu1 %661  ;;  %v1672_v44 = vsel %vm1086_vm12, 1.0, %v1921_v29 }
  0xd6   : > { %vm682_vm13 = vcmp.eq.s32.totalorder %v2087_v25, %v662_v57  ;;  %1856 = vset.pattern.permute.xlu1 %v1919_v16  ;;  %v1125_v47 = vsel %vm1103_vm8, %v1672_v44, 0.0  ;;  %v1113_v57 = vsel %vm1103_vm8, %v1668_v53, 0.0 }
  0xd7   : > { %v709_v60 = vadd.f32 %v1621_v55, %v653_v56  ;;  %v1618_v61 = vsel %vm682_vm13, 1.0, %v1921_v29  ;;  %782 = vperm.xlu1 %1856, %v1995_v6   ;;  %v2214_v62 = vpop.permute.xlu0 %885  ;;  %vm1080_vm13 = vcmp.gt.s32.totalorder %v1984_v3, 4294967295 }
  0xd8   : > { %v2216_v63 = vadd.f32 %v1618_v61, %v650_v59  ;;  %v1666_v49 = vsel %vm1080_vm13, 1.0, %v1921_v29  ;;  %vm906_vm13 = vcmp.eq.s32.totalorder %v2087_v25, %v2214_v62 }
  0xda   : > { %v400_v1 = vpop.permute.xlu1 %399 }
  0xdb   : > { %vm408_vm15 = vcmp.eq.s32.totalorder %v2087_v25, %v400_v1  ;;  %788 = vperm.xlu1 %1856, %v1999_v7   ;;  %v2221_v16 = vpop.permute.xlu0 %888 }
  0xdc   : > { %v1584_v45 = vsel %vm408_vm15, 1.0, %v1921_v29 }
  0xdd   : > { %v488_v58 = vadd.f32 %v1592_v0, %v1584_v45 }
  0xdf   : > { %791 = vperm.xlu1 %1856, %v2011_v10   ;;  %v453_v11 = vpop.permute.xlu1 %452 }
  0xe0   : > { %vm463_vm1 = vcmp.eq.s32.totalorder %v2087_v25, %v453_v11  ;;  %v2229_v12 = vpop.permute.xlu0 %717 }
  0xe1   : > { %v1591_v18 = vsel %vm463_vm1, 1.0, %v1921_v29 }
  0xe2   : > { %v487_v19 = vadd.f32 %v1591_v18, %v1583_v8 }
  0xe3   : > { %1858 = vset.pattern.permute.xlu1 %v1920_v17 }
  0xe4   : > { %841 = vperm.xlu1 %1858, %v2007_v9   ;;  %v665_v28 = vpop.permute.xlu1 %664  ;;  %v2234_v20 = vpop.permute.xlu0 %720 }
  0xe5   : > { %vm683_vm2 = vcmp.eq.s32.totalorder %v2087_v25, %v665_v28 }
  0xe6   : > { %v1619_v21 = vsel %vm683_vm2, 1.0, %v1921_v29  ;;  %vm1085_vm2 = vcmp.gt.s32.totalorder %v1999_v7, 4294967295 }
  0xe7   : > { %v2239_v13 = vadd.f32 %v1619_v21, %v2163_v22  ;;  %v1671_v59 = vsel %vm1085_vm2, 1.0, %v1921_v29 }
  0xe8   : > { %844 = vperm.xlu1 %1858, %v1999_v7   ;;  %v668_v23 = vpop.permute.xlu1 %667  ;;  %v727_v24 = vpop.permute.xlu0 %726  ;;  %v1122_v61 = vsel %vm1103_vm8, %v1671_v59, 0.0 }
  0xe9   : > { %vm684_vm3 = vcmp.eq.s32.totalorder %v2087_v25, %v668_v23  ;;  %vm741_vm4 = vcmp.eq.s32.totalorder %v2087_v25, %v727_v24 }
  0xea   : > { %v1620_v17 = vsel %vm684_vm3, 1.0, %v1921_v29  ;;  %v1629_v27 = vsel %vm741_vm4, 1.0, %v1921_v29  ;;  %vm1079_vm3 = vcmp.gt.s32.totalorder %v1980_v2, 4294967295 }
  0xeb   : > { %v2247_v30 = vadd.f32 %v1620_v17, %v2173_v33  ;;  %v2249_v31 = vadd.f32 %v1629_v27, %v709_v60  ;;  %v1665_v0 = vsel %vm1079_vm3, 1.0, %v1921_v29 }
  0xec   : > { %1859 = vset.pattern.permute.xlu1 %v1917_v14  ;;  %v2296_v60 = vpop.permute.xlu0 %735  ;;  %v1104_v45 = vsel %vm1103_vm8, %v1665_v0, 0.0 }
  0xed   : > { %894 = vperm.xlu1 %1859, %v1995_v6   ;;  %v506_v22 = vpop.permute.xlu1 %505  ;;  %v1670_v6 = vsel %vm1084_vm11, 1.0, %v1921_v29 }
  0xee   : > { %vm518_vm5 = vcmp.eq.s32.totalorder %v2087_v25, %v506_v22  ;;  %v1119_v43 = vsel %vm1103_vm8, %v1670_v6, 0.0 }
  0xef   : > { %v1598_v32 = vsel %vm518_vm5, 1.0, %v1921_v29  ;;  %1120 = vadd.xlane.f32.xlu0 %v1119_v43 }
  0xf0   : > { %v542_v34 = vadd.f32 %v1598_v32, %v2184_v40 }
  0xf1   : > { %900 = vperm.xlu1 %1859, %v1999_v7   ;;  %v774_v1 = vpop.permute.xlu0 %773 }
  0xf2   : > { %v2257_v35 = vpop.permute.xlu1 %714  ;;  %vm794_vm7 = vcmp.eq.s32.totalorder %v2087_v25, %v774_v1 }
  0xf3   : > { %1126 = vadd.xlane.f32.xlu0 %v1125_v47 }
  0xf5   : > { %903 = vperm.xlu1 %1859, %v2011_v10   ;;  %v1107_v10 = vsel %vm1103_vm8, %v1666_v49, 0.0  ;;  %v777_v18 = vpop.permute.xlu0 %776  ;;  %vm737_vm8 = vcmp.eq.s32.totalorder %v2087_v25, %v2257_v35 }
  0xf6   : > { %v1625_v22 = vsel %vm737_vm8, 1.0, %v1921_v29  ;;  %vm795_vm2 = vcmp.eq.s32.totalorder %v2087_v25, %v777_v18 }
  0xf7   : > { %v509_v33 = vpop.permute.xlu1 %508  ;;  %1108 = vadd.xlane.f32.xlu0 %v1107_v10 }
  0xf8   : > { %vm519_vm6 = vcmp.eq.s32.totalorder %v2087_v25, %v509_v33 }
  0xf9   : > { %v1599_v14 = vsel %vm519_vm6, 1.0, %v1921_v29  ;;  %v2310_v28 = vpop.permute.xlu0 %785  ;;  %vm738_vm6 = vcmp.eq.s32.totalorder %v2087_v25, %v2229_v12  ;;  %v1634_v12 = vsel %vm794_vm7, 1.0, %v1921_v29  ;;  %vm907_vm7 = vcmp.eq.s32.totalorder %v2087_v25, %v2221_v16 }
  0xfa   : > { %v543_v36 = vadd.f32 %v1599_v14, %v487_v19  ;;  %v1626_v27 = vsel %vm738_vm6, 1.0, %v1921_v29  ;;  %vm744_vm6 = vcmp.eq.s32.totalorder %v2087_v25, %v2296_v60 }
  0xfb   : > { %v512_v37 = vpop.permute.xlu1 %511  ;;  %v762_v32 = vadd.f32 %v1626_v27, %v2216_v63  ;;  %v1650_v63 = vsel %vm906_vm13, 1.0, %v1921_v29  ;;  %v1632_v10 = vsel %vm744_vm6, 1.0, %v1921_v29 }
  0xfc   : > { %vm520_vm10 = vcmp.eq.s32.totalorder %v2087_v25, %v512_v37 }
  0xfd   : > { %v1600_v40 = vsel %vm520_vm10, 1.0, %v1921_v29  ;;  %v818_v14 = vadd.f32 %v1634_v12, %v762_v32 }
  0xfe   : > { %v544_v42 = vadd.f32 %v1600_v40, %v488_v58  ;;  %v830_v24 = vpop.permute.xlu0 %829 }
  0xff   : > { %vm850_vm10 = vcmp.eq.s32.totalorder %v2087_v25, %v830_v24 }
 0x100   : > { %v2271_v4 = vpop.permute.xlu1 %723  ;;  %v1642_v35 = vsel %vm850_vm10, 1.0, %v1921_v29 }
 0x101   : > { %v874_v38 = vadd.f32 %v1642_v35, %v818_v14  ;;  %vm740_vm3 = vcmp.eq.s32.totalorder %v2087_v25, %v2271_v4 }
 0x102   : > { %v833_v6 = vpop.permute.xlu0 %832  ;;  %v1628_v4 = vsel %vm740_vm3, 1.0, %v1921_v29 }
 0x103   : > { %v930_v62 = vadd.f32 %v1650_v63, %v874_v38 }
 0x105   : > { %v562_v46 = vpop.permute.xlu1 %561 }
 0x106   : > { %vm574_vm14 = vcmp.eq.s32.totalorder %v2087_v25, %v562_v46  ;;  %v1635_v46 = vsel %vm795_vm2, 1.0, %v1921_v29 }
 0x107   : > { %v1606_v9 = vsel %vm574_vm14, 1.0, %v1921_v29 }
 0x108   : > { %v598_v48 = vadd.f32 %v1606_v9, %v542_v34 }
 0x10a   : > { %v2282_v50 = vpop.permute.xlu1 %770 }
 0x10b   : > { %vm793_vm11 = vcmp.eq.s32.totalorder %v2087_v25, %v2282_v50 }
 0x10c   : > { %v1633_v33 = vsel %vm793_vm11, 1.0, %v1921_v29 }
 0x10f   : > { %v565_v15 = vpop.permute.xlu1 %564 }
 0x110   : > { %vm575_vm15 = vcmp.eq.s32.totalorder %v2087_v25, %v565_v15 }
 0x111   : > { %v1607_v3 = vsel %vm575_vm15, 1.0, %v1921_v29  ;;  %vm739_vm15 = vcmp.eq.s32.totalorder %v2087_v25, %v2234_v20 }
 0x112   : > { %v599_v51 = vadd.f32 %v1607_v3, %v543_v36  ;;  %v761_v36 = vadd.f32 %v1625_v22, %v2204_v54  ;;  %v1627_v44 = vsel %vm739_vm15, 1.0, %v1921_v29  ;;  %v764_v3 = vadd.f32 %v1628_v4, %v2247_v30 }
 0x113   : > { %v568_v52 = vpop.permute.xlu1 %567  ;;  %v763_v9 = vadd.f32 %v1627_v44, %v2239_v13 }
 0x114   : > { %vm576_vm1 = vcmp.eq.s32.totalorder %v2087_v25, %v568_v52  ;;  %v817_v39 = vadd.f32 %v1633_v33, %v761_v36 }
 0x115   : > { %v1608_v55 = vsel %vm576_vm1, 1.0, %v1921_v29  ;;  %vm981_vm1 = vcmask 523264   ;;  %v819_v15 = vadd.f32 %v1635_v46, %v763_v9 }
 0x116   : > { %v2292_v56 = vadd.f32 %v1608_v55, %v544_v42 }
 0x118   : > { %v2298_v5 = vpop.permute.xlu1 %779 }
 0x119   : > { %1114 = vadd.xlane.f32.xlu1 %v1113_v57  ;;  %v1651_v57 = vsel %vm907_vm7, 1.0, %v1921_v29 }
 0x11d   : > { %v618_v7 = vpop.permute.xlu1 %617  ;;  %1123 = vadd.xlane.f32.xlu1 %v1122_v61 }
 0x11e   : > { %vm630_vm4 = vcmp.eq.s32.totalorder %v2087_v25, %v618_v7 }
 0x11f   : > { %v1614_v58 = vsel %vm630_vm4, 1.0, %v1921_v29  ;;  %vm851_vm4 = vcmp.eq.s32.totalorder %v2087_v25, %v833_v6 }
 0x120   : > { %v2306_v8 = vadd.f32 %v1614_v58, %v598_v48  ;;  %v1643_v48 = vsel %vm851_vm4, 1.0, %v1921_v29 }
 0x121   : > { %1105 = vadd.xlane.f32.xlu1 %v1104_v45  ;;  %v875_v53 = vadd.f32 %v1643_v48, %v819_v15  ;;  %v1180_v15 = vld [vmem:[%s2498_s4] sm:$0xff] }
 0x122   : > { %v827_v11 = vpop.permute.xlu1 %826 }
 0x123   : > { %vm849_vm12 = vcmp.eq.s32.totalorder %v2087_v25, %v827_v11  ;;  %v931_v30 = vadd.f32 %v1651_v57, %v875_v53  ;;  %v839_v11 = vpop.permute.xlu0 %838 }
 0x124   : > { %v1641_v37 = vsel %vm849_vm12, 1.0, %v1921_v29  ;;  %vm853_vm2 = vcmp.eq.s32.totalorder %v2087_v25, %v839_v11 }
 0x125   : > { %v873_v41 = vadd.f32 %v1641_v37, %v817_v39  ;;  %v1645_v35 = vsel %vm853_vm2, 1.0, %v1921_v29 }
 0x127   : > { %v621_v2 = vpop.permute.xlu1 %620 }
 0x128   : > { %vm631_vm5 = vcmp.eq.s32.totalorder %v2087_v25, %v621_v2  ;;  %v848_v2 = vpop.permute.xlu0 %847 }
 0x129   : > { %v1615_v19 = vsel %vm631_vm5, 1.0, %v1921_v29  ;;  %vm796_vm5 = vcmp.eq.s32.totalorder %v2087_v25, %v2298_v5 }
 0x12a   : > { %v2312_v21 = vadd.f32 %v1615_v19, %v599_v51  ;;  %v1636_v49 = vsel %vm796_vm5, 1.0, %v1921_v29 }
 0x12b   : > { %v624_v23 = vpop.permute.xlu1 %623  ;;  %v820_v55 = vadd.f32 %v1636_v49, %v764_v3  ;;  %v1181_v3 = vld [vmem:[%s2498_s4 + $0x8] sm:$0xff] }
 0x12c   : > { %vm632_vm0 = vcmp.eq.s32.totalorder %v2087_v25, %v624_v23  ;;  %v898_v22 = vpop.permute.xlu0 %897 }
 0x12d   : > { %v1616_v20 = vsel %vm632_vm0, 1.0, %v1921_v29  ;;  %vm910_vm4 = vcmp.eq.s32.totalorder %v2087_v25, %v898_v22 }
 0x12e   : > { %v656_v50 = vadd.f32 %v1616_v20, %v2292_v56  ;;  %v1654_v36 = vsel %vm910_vm4, 1.0, %v1921_v29 }
 0x130   : > { %v2316_v17 = vpop.permute.xlu1 %835 }
 0x131   : > { %vm852_vm8 = vcmp.eq.s32.totalorder %v2087_v25, %v2316_v17 }
 0x132   : > { %v1644_v13 = vsel %vm852_vm8, 1.0, %v1921_v29 }
 0x133   : > { %v876_v60 = vadd.f32 %v1644_v13, %v820_v55 }
 0x135   : > { %v2345_v34 = vpop.permute.xlu1 %673 }
 0x136   : > { %vm686_vm12 = vcmp.eq.s32.totalorder %v2087_v25, %v2345_v34 }
 0x137   : > { %v1622_v18 = vsel %vm686_vm12, 1.0, %v1921_v29 }
 0x138   : > { %v710_v23 = vadd.f32 %v1622_v18, %v2306_v8 }
 0x13a   : > { %v883_v40 = vpop.permute.xlu1 %882 }
 0x13b   : > { %vm905_vm14 = vcmp.eq.s32.totalorder %v2087_v25, %v883_v40 }
 0x13c   : > { %v1649_v42 = vsel %vm905_vm14, 1.0, %v1921_v29  ;;  %vm798_vm14 = vcmp.eq.s32.totalorder %v2087_v25, %v2310_v28 }
 0x13d   : > { %v929_v26 = vadd.f32 %v1649_v42, %v873_v41  ;;  %v1638_v27 = vsel %vm798_vm14, 1.0, %v1921_v29 }
 0x13f   : > { %v2362_v54 = vpop.permute.xlu1 %676  ;;  %v945_v43 = vpack.c.bf16 %v930_v62, %v929_v26 }
 0x140   : > { %vm687_vm3 = vcmp.eq.s32.totalorder %v2087_v25, %v2362_v54 }
 0x141   : > { %1731 = vmatprep.mubr.msk.bf16.mxu0 %vm981_vm1, %v945_v43  ;;  %v1623_v14 = vsel %vm687_vm3, 1.0, %v1921_v29 }
 0x142   : > { %v711_v40 = vadd.f32 %v1623_v14, %v2312_v21 }
 0x143   : > { %v680_v47 = vpop.permute.xlu1 %679 }
 0x144   : > { %vm688_vm10 = vcmp.eq.s32.totalorder %v2087_v25, %v680_v47 }
 0x145   : > { %v1624_v51 = vsel %vm688_vm10, 1.0, %v1921_v29  ;;  %vm856_vm10 = vcmp.eq.s32.totalorder %v2087_v25, %v848_v2 }
 0x146   : > { %v712_v52 = vadd.f32 %v1624_v51, %v656_v50  ;;  %v1648_v44 = vsel %vm856_vm10, 1.0, %v1921_v29  ;;  %v1771_v51 = vpack.c.bf16 %v1181_v3, %v1180_v15 }
 0x148   : > { %v892_v56 = vpop.permute.xlu1 %891  ;;  %v768_v59 = vadd.f32 %v1632_v10, %v712_v52  ;;  %1779 = vmatprep.subr.bf16.mxu1 %v1771_v51  ;;  %1772 = vmatprep.subr.bf16.mxu0 %v1771_v51  ;;  %v1865_v52 = vld [vmem:[%s2497_s3] sm:$0xff]  }
 0x149   : > { %vm908_vm11 = vcmp.eq.s32.totalorder %v2087_v25, %v892_v56  ;;  %1781 = vmatpush3.bf16.msra.mxu1 %v1771_v51 }
 0x14a   : > { %v1652_v5 = vsel %vm908_vm11, 1.0, %v1921_v29 }
 0x14b   : > { %v932_v61 = vadd.f32 %v1652_v5, %v876_v60 }
 0x14d   : > { %v946_v0 = vpack.c.bf16 %v932_v61, %v931_v30  ;;  %v730_v7 = vpop.permute.xlu1 %729 }
 0x14e   : > { %vm742_vm13 = vcmp.eq.s32.totalorder %v2087_v25, %v730_v7 }
 0x14f   : > { %1732 = vmatmul.mubr.msk.bf16.vlgmr.msra.gmra.mrb[0].mxu0 %vm981_vm1, %v946_v0  ;;  %v1630_v19 = vsel %vm742_vm13, 1.0, %v1921_v29 }
 0x150   : > { %v766_v17 = vadd.f32 %v1630_v19, %v710_v23  ;;  %1774 = vmatpush3.bf16.msra.mxu0 %v1771_v51  ;;  %v938_v19 = vld [vmem:[#allocation2 + $0x8] sm:$0xff] }
 0x151   : > { %v733_v1 = vpop.permute.xlu1 %732 }
 0x152   : > { %v822_v28 = vadd.f32 %v1638_v27, %v766_v17  ;;  %vm743_vm5 = vcmp.eq.s32.totalorder %v2087_v25, %v733_v1  ;;  %v939_v1 = vld [vmem:[#allocation2 + $0x10] sm:$0xff] }
 0x156   : > { %v783_v45 = vpop.permute.xlu1 %782 }
 0x157   : > { %vm797_vm15 = vcmp.eq.s32.totalorder %v2087_v25, %v783_v45 }
 0x158   : > { %v1637_v12 = vsel %vm797_vm15, 1.0, %v1921_v29 }
 0x159   : > { %v821_v8 = vadd.f32 %v1637_v12, %v2249_v31  ;;  %v1631_v31 = vsel %vm743_vm5, 1.0, %v1921_v29 }
 0x15a   : > { %v789_v58 = vpop.permute.xlu1 %788  ;;  %v767_v6 = vadd.f32 %v1631_v31, %v711_v40  ;;  %v1866_v31 = vld [vmem:[%s2497_s3 + $0x8] sm:$0xff]  }
 0x15b   : > { %v877_v38 = vadd.f32 %v1645_v35, %v821_v8  ;;  %vm799_vm7 = vcmp.eq.s32.totalorder %v2087_v25, %v789_v58  ;;  %v937_v58 = vld [vmem:[#allocation2] sm:$0xff] }
 0x15c   : > { %v1639_v26 = vsel %vm799_vm7, 1.0, %v1921_v29 }
 0x15d   : > { %v823_v46 = vadd.f32 %v1639_v26, %v767_v6  ;;  %v1112_v53 = vpop.xlane.xlu0 %1111  ;;  %v941_v26 = vld [vmem:[#allocation2 + $0x20] sm:$0xff]  ;;  %v944_v6 = vld [vmem:[#allocation2 + $0x38] sm:$0xff] }
 0x15e   : > { %v792_v16 = vpop.permute.xlu1 %791 }
 0x15f   : > { %vm800_vm6 = vcmp.eq.s32.totalorder %v2087_v25, %v792_v16  ;;  %v940_v16 = vld [vmem:[#allocation2 + $0x18] sm:$0xff] }
 0x160   : > { %v1640_v39 = vsel %vm800_vm6, 1.0, %v1921_v29 }
 0x161   : > { %v824_v54 = vadd.f32 %v1640_v39, %v768_v59  ;;  %v1118_v55 = vpop.xlane.xlu0 %1117 }
 0x162   : > { %vm1132_vm2 = vcmp.eq.f32.partialorder %v1118_v55, 0.0 }
 0x163   : > { %v842_v24 = vpop.permute.xlu1 %841  ;;  %v880_v9 = vadd.f32 %v1648_v44, %v824_v54  ;;  %v942_v44 = vld [vmem:[#allocation2 + $0x28] sm:$0xff] }
 0x164   : > { %vm854_vm0 = vcmp.eq.s32.totalorder %v2087_v25, %v842_v24 }
 0x165   : > { %v1646_v34 = vsel %vm854_vm0, 1.0, %v1921_v29 }
 0x166   : > { %v878_v33 = vadd.f32 %v1646_v34, %v822_v28 }
 0x167   : > { %v845_v32 = vpop.permute.xlu1 %844 }
 0x168   : > { %v934_v41 = vadd.f32 %v1654_v36, %v878_v33  ;;  %vm855_vm11 = vcmp.eq.s32.totalorder %v2087_v25, %v845_v32 }
 0x169   : > { %v1647_v20 = vsel %vm855_vm11, 1.0, %v1921_v29 }
 0x16a   : > { %v879_v47 = vadd.f32 %v1647_v20, %v823_v46 }
 0x16c   : > { %v895_v37 = vpop.permute.xlu1 %894 }
 0x16d   : > { %vm909_vm8 = vcmp.eq.s32.totalorder %v2087_v25, %v895_v37 }
 0x16e   : > { %v1653_v63 = vsel %vm909_vm8, 1.0, %v1921_v29 }
 0x16f   : > { %v933_v42 = vadd.f32 %v1653_v63, %v877_v38  ;;  %v1140_v63 = vsel %vm1132_vm2, 1.0, %v1118_v55 }
 0x170   : > { %v901_v62 = vpop.permute.xlu1 %900 }
 0x171   : > { %v947_v43 = vpack.c.bf16 %v934_v41, %v933_v42  ;;  %vm911_vm12 = vcmp.eq.s32.totalorder %v2087_v25, %v901_v62  ;;  %v943_v41 = vld [vmem:[#allocation2 + $0x30] sm:$0xff] }
 0x172   : > { %v1655_v21 = vsel %vm911_vm12, 1.0, %v1921_v29 }
 0x173   : > { %1735 = vmatprep.mubr.msk.bf16.mxu0 %vm981_vm1, %v947_v43  ;;  %v935_v49 = vadd.f32 %v1655_v21, %v879_v47 }
 0x174   : > { %v904_v4 = vpop.permute.xlu1 %903 }
 0x175   : > { %vm912_vm13 = vcmp.eq.s32.totalorder %v2087_v25, %v904_v4  ;;  %v1182_v25 = vld [vmem:[%s2498_s4 + $0x10] sm:$0xff] }
 0x176   : > { %v1656_v48 = vsel %vm912_vm13, 1.0, %v1921_v29  ;;  %v1183_v29 = vld [vmem:[%s2498_s4 + $0x18] sm:$0xff] }
 0x177   : > { %v936_v50 = vadd.f32 %v1656_v48, %v880_v9  ;;  %v1775_v13 = vpack.c.bf16 %v1183_v29, %v1182_v25 }
 0x179   : > { %v948_v10 = vpack.c.bf16 %v936_v50, %v935_v49  ;;  %1780 = vmatprep.subr.bf16.mxu1 %v1775_v13  ;;  %1776 = vmatprep.subr.bf16.mxu0 %v1775_v13 }
 0x17a   : > { %1782 = vmatpush3.bf16.msra.mxu1 %v1775_v13  ;;  %1778 = vmatpush3.bf16.msra.mxu0 %v1775_v13 }
 0x17b   : > { %1736 = vmatmul.mubr.msk.bf16.gmra.mrb[4].mxu0 %vm981_vm1, %v948_v10  ;;  %1759 = vmatprep.subr.bf16.mxu1 %v1865_v52  ;;  %vm1130_vm1 = vcmp.eq.f32.partialorder %v1112_v53, 0.0 }
 0x17c   : > { %v1121_v56 = vpop.xlane.xlu0 %1120  ;;  %v1138_v61 = vsel %vm1130_vm1, 1.0, %v1112_v53  ;;  %v1867_v53 = vld [vmem:[%s2158_s7] sm:$0xff]  }
 0x17d   : > { %1871 = vrcp.f32 %v1138_v61  ;;  %vm1133_vm3 = vcmp.eq.f32.partialorder %v1121_v56, 0.0 }
 0x17e   : > { %v1141_v40 = vsel %vm1133_vm3, 1.0, %v1121_v56  ;;  %v1869_v56 = vld [vmem:[%s2158_s7 + $0x10] sm:$0xff]  }
 0x180   : > { %v2449_v60 = vpop.xlane.xlu0 %1126 }
 0x181   : > { %vm1135_vm5 = vcmp.eq.f32.partialorder %v2449_v60, 0.0 }
 0x182   : > { %v1143_v20 = vsel %vm1135_vm5, 1.0, %v2449_v60 }
 0x184   : > { %v1109_v30 = vpop.xlane.xlu0 %1108 }
 0x185   : > { %vm1129_vm0 = vcmp.eq.f32.partialorder %v1109_v30, 0.0 }
 0x186   : > { %v1137_v45 = vsel %vm1129_vm0, 1.0, %v1109_v30 }
 0x187   : > { %v1872_v22 = vpop.eup %1871 }
 0x1a6   : > { %v1115_v57 = vpop.xlane.xlu1 %1114 }
 0x1a7   : > { %vm1131_vm15 = vcmp.eq.f32.partialorder %v1115_v57, 0.0 }
 0x1a8   : > { %v1139_v7 = vsel %vm1131_vm15, 1.0, %v1115_v57  ;;  %v1868_v57 = vld [vmem:[%s2158_s7 + $0x8] sm:$0xff]  }
 0x1aa   : > { %v1124_v59 = vpop.xlane.xlu1 %1123 }
 0x1ab   : > { %vm1134_vm4 = vcmp.eq.f32.partialorder %v1124_v59, 0.0 }
 0x1ac   : > { %v1142_v42 = vsel %vm1134_vm4, 1.0, %v1124_v59  ;;  %v1870_v59 = vld [vmem:[%s2158_s7 + $0x18] sm:$0xff]  }
 0x1ae   : > { %v1106_v5 = vpop.xlane.xlu1 %1105 }
 0x1af   : > { %vm1128_vm14 = vcmp.eq.f32.partialorder %v1106_v5, 0.0 }
 0x1b0   : > { %v1136_v0 = vsel %vm1128_vm14, 1.0, %v1106_v5 }
 0x1b1   : > { %1873 = vrcp.f32 %v1136_v0 }
 0x1b2   : > { %1875 = vrcp.f32 %v1139_v7 }
 0x1b3   : > { %1877 = vrcp.f32 %v1137_v45 }
 0x1b4   : > { %1879 = vrcp.f32 %v1140_v63 }
 0x1b5   : > { %1881 = vrcp.f32 %v1141_v40 }
 0x1b6   : > { %1883 = vrcp.f32 %v1142_v42 }
 0x1b7   : > { %1885 = vrcp.f32 %v1143_v20 }
 0x1bb   : > { %v1874_v32 = vpop.eup %1873 }
 0x1bc   : > { %v1876_v34 = vpop.eup %1875 }
 0x1bd   : > { %v1878_v28 = vpop.eup %1877 }
 0x1be   : > { %v1880_v48 = vpop.eup %1879 }
 0x1bf   : > { %v1882_v49 = vpop.eup %1881 }
 0x1c0   : > { %v1884_v10 = vpop.eup %1883 }
 0x1c1   : > { %v1886_v29 = vpop.eup %1885 }
 0x222   : > { %v1733_v11 = vpop.f32.mrb[0].mxu0 }
 0x223   : > { %v1061_v18 = vadd.f32 %v1733_v11, %v939_v1  ;;  %v1028_v2 = vpop.f32.mrb[1].mxu0 }
 0x224   : > { %v1059_v23 = vadd.f32 %v1028_v2, %v937_v58  ;;  %v1734_v24 = vpop.f32.mrb[2].mxu0 }
 0x225   : > { %1070 = vst.msk [vmem:[#allocation2 + $0x10] sm:$0xff] %vm348_vm9, %v1061_v18  ;;  %v1062_v17 = vadd.f32 %v1734_v24, %v940_v16  ;;  %v1031_v27 = vpop.f32.mrb[3].mxu0 }
 0x226   : > { %1068 = vst.msk [vmem:[#allocation2] sm:$0xff] %vm348_vm9, %v1059_v23  ;;  %v1060_v12 = vadd.f32 %v1031_v27, %v938_v19 }
 0x227   : > { %1071 = vst.msk [vmem:[#allocation2 + $0x18] sm:$0xff] %vm348_vm9, %v1062_v17 }
 0x228   : > { %1069 = vst.msk [vmem:[#allocation2 + $0x8] sm:$0xff] %vm348_vm9, %v1060_v12 }
 0x22c   : > { %v1154_v8 = vld [vmem:[#allocation2 + $0x10] sm:$0xff] }
 0x22d   : > { %v1162_v35 = vmul.f32 %v1872_v22, %v1154_v8  ;;  %v1152_v33 = vld [vmem:[#allocation2] sm:$0xff] }
 0x22e   : > { %v1160_v14 = vmul.f32 %v1874_v32, %v1152_v33  ;;  %v1155_v36 = vld [vmem:[#allocation2 + $0x18] sm:$0xff] }
 0x22f   : > { %1750 = vmatprep.mubr.msk.f32.mxu1 %vm348_vm9, %v1162_v35  ;;  %v1163_v37 = vmul.f32 %v1876_v34, %v1155_v36  ;;  %v1153_v38 = vld [vmem:[#allocation2 + $0x8] sm:$0xff] }
 0x230   : > { %1747 = vmatprep.mubr.msk.f32.mxu0 %vm348_vm9, %v1160_v14  ;;  %v1161_v39 = vmul.f32 %v1878_v28, %v1153_v38 }
 0x231   : > { %1751 = vmatmul.mubr.msk.f32.vlgmr.msra.gmra.mrb[0].mxu1 %vm348_vm9, %v1163_v37 }
 0x232   : > { %1748 = vmatmul.mubr.msk.f32.vlgmr.msra.gmra.mrb[8].mxu0 %vm348_vm9, %v1161_v39  ;;  %1760 = vmatpush3.bf16.msra.mxu1 %v1865_v52 }
 0x233   : > { %1761 = vmatprep.subr.bf16.mxu1 %v1866_v31 }
 0x236   : > { %1762 = vmatpush3.bf16.msra.mxu1 %v1866_v31 }
 0x24e   : > { %v1737_v62 = vpop.f32.mrb[4].mxu0 }
 0x24f   : > { %v1065_v54 = vadd.f32 %v1737_v62, %v943_v41  ;;  %v1044_v43 = vpop.f32.mrb[5].mxu0 }
 0x250   : > { %v1063_v46 = vadd.f32 %v1044_v43, %v941_v26  ;;  %v1738_v21 = vpop.f32.mrb[6].mxu0 }
 0x251   : > { %1074 = vst.msk [vmem:[#allocation2 + $0x30] sm:$0xff] %vm348_vm9, %v1065_v54  ;;  %v1066_v4 = vadd.f32 %v1738_v21, %v944_v6  ;;  %v1047_v9 = vpop.f32.mrb[7].mxu0 }
 0x252   : > { %1072 = vst.msk [vmem:[#allocation2 + $0x20] sm:$0xff] %vm348_vm9, %v1063_v46  ;;  %v1064_v47 = vadd.f32 %v1047_v9, %v942_v44 }
 0x253   : > { %1075 = vst.msk [vmem:[#allocation2 + $0x38] sm:$0xff] %vm348_vm9, %v1066_v4 }
 0x254   : > { %1073 = vst.msk [vmem:[#allocation2 + $0x28] sm:$0xff] %vm348_vm9, %v1064_v47 }
 0x258   : > { %v1158_v3 = vld [vmem:[#allocation2 + $0x30] sm:$0xff] }
 0x259   : > { %v1156_v50 = vld [vmem:[#allocation2 + $0x20] sm:$0xff]  ;;  %v1166_v13 = vmul.f32 %v1884_v10, %v1158_v3 }
 0x25a   : > { %v1164_v15 = vmul.f32 %v1880_v48, %v1156_v50  ;;  %v1159_v52 = vld [vmem:[#allocation2 + $0x38] sm:$0xff] }
 0x25b   : > { %v1157_v51 = vld [vmem:[#allocation2 + $0x28] sm:$0xff]  ;;  %v1167_v55 = vmul.f32 %v1886_v29, %v1159_v52 }
 0x25c   : > { %1753 = vmatprep.mubr.msk.f32.mxu1 %vm348_vm9, %v1164_v15  ;;  %v1165_v25 = vmul.f32 %v1882_v49, %v1157_v51 }
 0x25e   : > { %1754 = vmatmul.mubr.msk.f32.gmra.mrb[2].mxu1 %vm348_vm9, %v1165_v25 }
 0x25f   : > { %1756 = vmatprep.mubr.msk.f32.mxu1 %vm348_vm9, %v1166_v13 }
 0x262   : > { %1757 = vmatmul.mubr.msk.f32.gmra.mrb[4].mxu1 %vm348_vm9, %v1167_v55 }
 0x263   : > { %1763 = vmatprep.mubr.msk.bf16.mxu1 %vm348_vm9, %v1867_v53 }
 0x266   : > { %1764 = vmatmul.mubr.msk.bf16.vlgmr.msra.gmra.mrb[8].mxu1 %vm348_vm9, %v1868_v57 }
 0x267   : > { %1767 = vmatprep.mubr.msk.bf16.mxu1 %vm348_vm9, %v1869_v56 }
 0x26e   : > { %1768 = vmatmul.mubr.msk.bf16.gmra.mrb[12].mxu1 %vm348_vm9, %v1870_v59 }
 0x304   : > { %v1752_v60 = vpop.f32.mrb[0].mxu1 }
 0x305   : > { %v1749_v5 = vpop.f32.mrb[8].mxu0  ;;  %v1284_v30 = vpop.f32.mrb[1].mxu1 }
 0x306   : > { %v1274_v61 = vpop.f32.mrb[9].mxu0 }
 0x331   : > { %v1755_v0 = vpop.f32.mrb[2].mxu1 }
 0x332   : > { %v1294_v7 = vpop.f32.mrb[3].mxu1 }
 0x335   : > { %v1758_v1 = vpop.f32.mrb[4].mxu1 }
 0x336   : > { %v1304_v45 = vpop.f32.mrb[5].mxu1 }
 0x339   : > { %v1765_v58 = vpop.f32.mrb[8].mxu1 }
 0x33a   : > { %v1400_v11 = vadd.f32 %v1765_v58, %v1284_v30  ;;  %v1391_v16 = vpop.f32.mrb[9].mxu1 }
 0x33b   : > { %v1392_v18 = vadd.f32 %v1391_v16, %v1274_v61  ;;  %v1766_v2 = vpop.f32.mrb[10].mxu1 }
 0x33c   : > { %v1424_v19 = vmax.f32 %v1400_v11, 0.0  ;;  %v1403_v23 = vadd.f32 %v1766_v2, %v1752_v60  ;;  %v1394_v24 = vpop.f32.mrb[11].mxu1 }
 0x33d   : > { %v1422_v17 = vmax.f32 %v1392_v18, 0.0  ;;  %v1395_v27 = vadd.f32 %v1749_v5, %v1394_v24 }
 0x33e   : > { %1432 = vst [vmem:[%s341_s27 + $0x10] sm:$0xff] %v1424_v19  ;;  %v1425_v12 = vmax.f32 %v1403_v23, 0.0 }
 0x33f   : > { %1430 = vst [vmem:[%s341_s27] sm:$0xff] %v1422_v17  ;;  %v1423_v22 = vmax.f32 %v1395_v27, 0.0 }
 0x340   : > { %1433 = vst [vmem:[%s341_s27 + $0x18] sm:$0xff] %v1425_v12 }
 0x341   : > { %1431 = vst [vmem:[%s341_s27 + $0x8] sm:$0xff] %v1423_v22  ;;  %v1769_v32 = vpop.f32.mrb[12].mxu1 }
 0x342   : > { %v1416_v34 = vadd.f32 %v1769_v32, %v1304_v45  ;;  %v1407_v8 = vpop.f32.mrb[13].mxu1 }
 0x343   : > { %v1408_v28 = vadd.f32 %v1407_v8, %v1294_v7  ;;  %v1770_v35 = vpop.f32.mrb[14].mxu1 }
 0x344   : > { %v1428_v33 = vmax.f32 %v1416_v34, 0.0  ;;  %v1419_v14 = vadd.f32 %v1770_v35, %v1758_v1  ;;  %v1410_v36 = vpop.f32.mrb[15].mxu1 }
 0x345   : > { %v1426_v37 = vmax.f32 %v1408_v28, 0.0  ;;  %v1411_v38 = vadd.f32 %v1755_v0, %v1410_v36 }
 0x346   : > { %1436 = vst [vmem:[%s341_s27 + $0x30] sm:$0xff] %v1428_v33  ;;  %v1429_v31 = vmax.f32 %v1419_v14, 0.0 }
 0x347   : > { %1434 = vst [vmem:[%s341_s27 + $0x20] sm:$0xff] %v1426_v37  ;;  %v1427_v39 = vmax.f32 %v1411_v38, 0.0 }
 0x348   : > { %1437 = vst [vmem:[%s341_s27 + $0x38] sm:$0xff] %v1429_v31 }
 0x349   : > { %1435 = vst [vmem:[%s341_s27 + $0x28] sm:$0xff] %v1427_v39 }
 0x34a PF: > { %s15_s20 = sadd.s32 1, %s1909_s20   ;;  %s2500_s18 = smov %s1905_s19 }
 0x34b   : > { %p12_p5 = scmp.ge.s32.totalorder %s15_s20, 4   ;;  %s2501_s19 = smov %s2503_s21 }
 0x34d   :  { %14 = sbr.rel (!%p12_p5) target bundleno = 2 (0x2), region = 84 }

</bundles_post_ra>
